<compile_context>
chip_gen: v7x
topology: tpu7x:2x2x1
jax: 0.10.0
libtpu: 0.0.40
codegen_flags: <defaults>
</compile_context>

<pallas_src>
import functools

import jax
import jax.numpy as jnp
from jax.experimental import pallas as pl
from jax.experimental.pallas import tpu as pltpu


def _static_int(v):
    """Return v as a positive Python int, or None if it is not static/usable."""
    try:
        if v is None or isinstance(v, bool):
            return None
        i = int(v)
        return i if i > 0 else None
    except Exception:  # tracers / exotic types -> ignore
        return None


def _tpu_info():
    """Best-effort hardware query; conservative fallbacks if unavailable."""
    vmem_bytes = 64 * 1024 * 1024   # conservative default (v7x-sized)
    num_cores = 1
    try:
        info = pltpu.get_tpu_info()
        v = _static_int(getattr(info, "vmem_capacity_bytes", None))
        if v is not None:
            vmem_bytes = v
        for attr in ("num_cores", "num_tensorcores", "cores_per_chip",
                     "num_cores_per_chip", "core_count"):
            n = _static_int(getattr(info, attr, None))
            if n is not None:
                num_cores = n
                break
    except Exception:  # detection must never break the kernel
        pass
    return vmem_bytes, num_cores


def _dice_partial_kernel(x_ref, t_ref, inter_ref, isq_ref, tsq_ref,
                         *, ncols, blocks_per_split, tn, ragged):
    c = pl.program_id(0)   # split axis ("parallel"; sharded across TCs where supported)
    k = pl.program_id(1)   # reduction step within the split

    @pl.when(k == 0)
    def _():
        inter_ref[...] = jnp.zeros_like(inter_ref)
        isq_ref[...] = jnp.zeros_like(isq_ref)
        tsq_ref[...] = jnp.zeros_like(tsq_ref)

    def accumulate(masked):
        x = x_ref[...].astype(jnp.float32)
        t = t_ref[...].astype(jnp.float32)
        # sigmoid as a single EUP tanh + two VALU ops (no f32 divide);
        # differs from jax.nn.sigmoid only at the ULP level.
        s = 0.5 * (jnp.tanh(0.5 * x) + 1.0)
        if masked:
            col0 = (c * blocks_per_split + k) * tn
            col = col0 + jax.lax.broadcasted_iota(jnp.int32, x.shape, 1)
            valid = col < ncols
            s = jnp.where(valid, s, 0.0)
            t = jnp.where(valid, t, 0.0)
        inter_ref[...] += jnp.sum(s * t, axis=1, keepdims=True)
        isq_ref[...] += jnp.sum(s * s, axis=1, keepdims=True)
        tsq_ref[...] += jnp.sum(t * t, axis=1, keepdims=True)

    if not ragged:
        # Reduction dim is an exact multiple of tn: never any masking.
        accumulate(False)
    else:
        # Only the single global last block overhangs ncols (splits are exact).
        is_last = jnp.logical_and(c == pl.num_programs(0) - 1,
                                  k == pl.num_programs(1) - 1)

        @pl.when(is_last)
        def _():
            accumulate(True)

        @pl.when(jnp.logical_not(is_last))
        def _():
            accumulate(False)


@jax.jit
def dice_loss(inputs, targets):
    """Soft dice loss matching the PyTorch DiceLoss.forward semantics."""
    B = inputs.shape[0]
    x = inputs.reshape(B, -1)
    t = targets.reshape(B, -1)
    N = x.shape[1]

    vmem_bytes, num_cores = _tpu_info()

    # Sublane fold: largest factor of N from {16 (packed dtypes), 8, 4, 2}
    # so vregs are sublane-full even for tiny batch sizes.
    itemsize = max(x.dtype.itemsize, t.dtype.itemsize)
    fold_candidates = (16, 8, 4, 2) if itemsize <= 2 else (8, 4, 2)
    rows_per_batch = 1
    for f in fold_candidates:
        if N >= f and N % f == 0:
            rows_per_batch = f
            break
    rows = B * rows_per_batch
    ncols = N // rows_per_batch
    x = x.reshape(rows, ncols)   # free, contiguous reshape
    t = t.reshape(rows, ncols)

    # Reduction-block width from a generation-dependent VMEM budget
    # (2 inputs x 2 pipeline buffers of (rows, tn)).
    if vmem_bytes >= 96 * 1024 * 1024:        # v5e / v6e: 128 MiB physical
        budget, vmem_limit = 48 * 1024 * 1024, 96 * 1024 * 1024
    else:                                     # v7x (64 MiB) or unknown
        budget, vmem_limit = 24 * 1024 * 1024, 40 * 1024 * 1024
    rows_pad = ((rows + 7) // 8) * 8
    per_col = 2 * rows_pad * (x.dtype.itemsize + t.dtype.itemsize)
    tn = max(128, (budget // per_col) // 128 * 128)
    tn = min(tn, pl.cdiv(ncols, 128) * 128)
    n_blocks = pl.cdiv(ncols, tn)

    # Exact split (no clamped dummy blocks, no wasted DMA): 2-way only when it
    # divides the block count evenly.  On multi-TC chips, nudge tn down to
    # make the count even so both TensorCores get work.
    num_splits = 1
    if n_blocks >= 2:
        if n_blocks % 2 != 0 and num_cores >= 2:
            tn_try = pl.cdiv(pl.cdiv(ncols, n_blocks + 1), 128) * 128
            if tn_try >= 128 and pl.cdiv(ncols, tn_try) % 2 == 0:
                tn = tn_try
                n_blocks = pl.cdiv(ncols, tn)
        if n_blocks % 2 == 0:
            num_splits = 2
    blocks_per_split = n_blocks // num_splits
    ragged = (ncols % tn) != 0

    in_map = lambda c, k: (0, c * blocks_per_split + k)
    out_map = lambda c, k: (c, 0, 0)

    kernel = functools.partial(
        _dice_partial_kernel,
        ncols=ncols, blocks_per_split=blocks_per_split, tn=tn, ragged=ragged)

    out_sds = jax.ShapeDtypeStruct((num_splits, rows, 1), jnp.float32)
    inter, isq, tsq = pl.pallas_call(
        kernel,
        out_shape=(out_sds, out_sds, out_sds),
        grid_spec=pltpu.PrefetchScalarGridSpec(
            num_scalar_prefetch=0,
            grid=(num_splits, blocks_per_split),
            in_specs=[
                pl.BlockSpec((rows, tn), in_map),
                pl.BlockSpec((rows, tn), in_map),
            ],
            out_specs=(
                pl.BlockSpec((None, rows, 1), out_map),
                pl.BlockSpec((None, rows, 1), out_map),
                pl.BlockSpec((None, rows, 1), out_map),
            ),
        ),
        compiler_params=pltpu.CompilerParams(
            # TODO(synk): on v7x, pltpu.CORE_PARALLEL on the split axis would
            # guarantee 2-TC sharding; "parallel" is the portable safe choice.
            dimension_semantics=("parallel", "arbitrary"),
            vmem_limit_bytes=vmem_limit,
        ),
        cost_estimate=pl.CostEstimate(
            flops=8 * rows * ncols,
            transcendentals=rows * ncols,
            bytes_accessed=(x.size * x.dtype.itemsize
                            + t.size * t.dtype.itemsize),
        ),
    )(x, t)

    # Tiny JAX epilogue: combine splits and sub-rows, finish the dice formula.
    inter_b = inter.sum(axis=0).reshape(B, rows_per_batch).sum(axis=1)
    isq_b = isq.sum(axis=0).reshape(B, rows_per_batch).sum(axis=1)
    tsq_b = tsq.sum(axis=0).reshape(B, rows_per_batch).sum(axis=1)
    eps = 1e-07
    loss = 1.0 - 2.0 * inter_b / (isq_b + tsq_b + eps)
    return jnp.mean(loss)


def _dice_loss_ref(inputs, targets):
    """Pure-JAX reference mirroring the PyTorch module."""
    s = jax.nn.sigmoid(inputs)
    B = inputs.shape[0]
    iflat = s.reshape(B, -1)
    tflat = targets.reshape(B, -1)
    inter = jnp.sum(iflat * tflat, axis=1)
    loss = 1.0 - 2.0 * inter / (
        jnp.sum(iflat**2, axis=1) + jnp.sum(tflat**2, axis=1) + 1e-07
    )
    return jnp.mean(loss)


if __name__ == "__main__":
    key = jax.random.PRNGKey(0)
    k1, k2 = jax.random.split(key)

    # NCHW logits and binary targets, small shapes.
    B, C, H, W = 2, 4, 16, 16
    logits = jax.random.normal(k1, (B, C, H, W), dtype=jnp.float32)
    targets = (
        jax.random.uniform(k2, (B, C, H, W), dtype=jnp.float32) > 0.5
    ).astype(jnp.float32)

    out = jax.block_until_ready(dice_loss(logits, targets))

    ref = _dice_loss_ref(logits, targets)
    assert jnp.allclose(out, ref, atol=1e-5, rtol=1e-5), (out, ref)

    print("KERNEL_OK")
</pallas_src>

<mosaic_0001>
module attributes {stable_mosaic.version = 11 : i64} {
  func.func @_dice_partial_kernel(%arg0: i32, %arg1: i32, %arg2: memref<16x128xf32, #tpu.memory_space<vmem>>, %arg3: memref<16x128xf32, #tpu.memory_space<vmem>>, %arg4: memref<1x16x1xf32, #tpu.memory_space<vmem>>, %arg5: memref<1x16x1xf32, #tpu.memory_space<vmem>>, %arg6: memref<1x16x1xf32, #tpu.memory_space<vmem>>) attributes {dimension_semantics = [#tpu.dimension_semantics<parallel>, #tpu.dimension_semantics<arbitrary>], iteration_bounds = array<i64: 1, 1>, scalar_prefetch = 0 : i64, scratch_operands = 0 : i64, tpu.core_type = #tpu.core_type<tc>, window_params = [{transform_indices = @transform_0, window_bounds = array<i64: 16, 128>}, {transform_indices = @transform_1, window_bounds = array<i64: 16, 128>}, {transform_indices = @transform_2, window_bounds = array<i64: 1, 16, 1>}, {transform_indices = @transform_3, window_bounds = array<i64: 1, 16, 1>}, {transform_indices = @transform_4, window_bounds = array<i64: 1, 16, 1>}]} {
    %c0_i32 = arith.constant 0 : i32
    %0 = arith.cmpi eq, %arg1, %c0_i32 : i32
    %1 = arith.extui %0 : i1 to i32
    %c0_i32_0 = arith.constant 0 : i32
    %2 = arith.cmpi ne, %1, %c0_i32_0 : i32
    scf.if %2 {
      %cst_27 = arith.constant 0.000000e+00 : f32
      %39 = vector.broadcast %cst_27 : f32 to vector<16x1xf32>
      %c0_28 = arith.constant 0 : index
      %c0_29 = arith.constant 0 : index
      %c0_30 = arith.constant 0 : index
      %40 = vector.load %arg4[%c0_28, %c0_29, %c0_30] : memref<1x16x1xf32, #tpu.memory_space<vmem>>, vector<1x16x1xf32>
      %41 = vector.shape_cast %40 : vector<1x16x1xf32> to vector<16x1xf32>
      %42 = vector.shape_cast %39 : vector<16x1xf32> to vector<1x16x1xf32>
      tpu.vector_store %arg4[%c0_28, %c0_29, %c0_30], %42 {strides = array<i32>} : memref<1x16x1xf32, #tpu.memory_space<vmem>>, vector<1x16x1xf32>,
      %cst_31 = arith.constant 0.000000e+00 : f32
      %43 = vector.broadcast %cst_31 : f32 to vector<16x1xf32>
      %c0_32 = arith.constant 0 : index
      %c0_33 = arith.constant 0 : index
      %c0_34 = arith.constant 0 : index
      %44 = vector.load %arg5[%c0_32, %c0_33, %c0_34] : memref<1x16x1xf32, #tpu.memory_space<vmem>>, vector<1x16x1xf32>
      %45 = vector.shape_cast %44 : vector<1x16x1xf32> to vector<16x1xf32>
      %46 = vector.shape_cast %43 : vector<16x1xf32> to vector<1x16x1xf32>
      tpu.vector_store %arg5[%c0_32, %c0_33, %c0_34], %46 {strides = array<i32>} : memref<1x16x1xf32, #tpu.memory_space<vmem>>, vector<1x16x1xf32>,
      %cst_35 = arith.constant 0.000000e+00 : f32
      %47 = vector.broadcast %cst_35 : f32 to vector<16x1xf32>
      %c0_36 = arith.constant 0 : index
      %c0_37 = arith.constant 0 : index
      %c0_38 = arith.constant 0 : index
      %48 = vector.load %arg6[%c0_36, %c0_37, %c0_38] : memref<1x16x1xf32, #tpu.memory_space<vmem>>, vector<1x16x1xf32>
      %49 = vector.shape_cast %48 : vector<1x16x1xf32> to vector<16x1xf32>
      %50 = vector.shape_cast %47 : vector<16x1xf32> to vector<1x16x1xf32>
      tpu.vector_store %arg6[%c0_36, %c0_37, %c0_38], %50 {strides = array<i32>} : memref<1x16x1xf32, #tpu.memory_space<vmem>>, vector<1x16x1xf32>,
    } else {
    }
    %c0 = arith.constant 0 : index
    %c0_1 = arith.constant 0 : index
    %3 = vector.load %arg2[%c0, %c0_1] : memref<16x128xf32, #tpu.memory_space<vmem>>, vector<16x128xf32>
    %c0_2 = arith.constant 0 : index
    %c0_3 = arith.constant 0 : index
    %4 = vector.load %arg3[%c0_2, %c0_3] : memref<16x128xf32, #tpu.memory_space<vmem>>, vector<16x128xf32>
    %cst = arith.constant 5.000000e-01 : f32
    %5 = vector.broadcast %cst : f32 to vector<16x128xf32>
    %6 = arith.mulf %5, %3 : vector<16x128xf32>
    %7 = math.tanh %6 : vector<16x128xf32>
    %cst_4 = arith.constant 1.000000e+00 : f32
    %8 = vector.broadcast %cst_4 : f32 to vector<16x128xf32>
    %9 = arith.addf %7, %8 : vector<16x128xf32>
    %cst_5 = arith.constant 5.000000e-01 : f32
    %10 = vector.broadcast %cst_5 : f32 to vector<16x128xf32>
    %11 = arith.mulf %10, %9 : vector<16x128xf32>
    %c0_6 = arith.constant 0 : index
    %c0_7 = arith.constant 0 : index
    %c0_8 = arith.constant 0 : index
    %12 = vector.load %arg4[%c0_6, %c0_7, %c0_8] : memref<1x16x1xf32, #tpu.memory_space<vmem>>, vector<1x16x1xf32>
    %13 = vector.shape_cast %12 : vector<1x16x1xf32> to vector<16x1xf32>
    %14 = arith.mulf %11, %4 : vector<16x128xf32>
    %cst_9 = arith.constant dense<0.000000e+00> : vector<16xf32>
    %15 = vector.multi_reduction <add>, %14, %cst_9 [1] : vector<16x128xf32> to vector<16xf32>
    %16 = vector.shape_cast %15 : vector<16xf32> to vector<16x1xf32>
    %17 = arith.addf %13, %16 : vector<16x1xf32>
    %c0_10 = arith.constant 0 : index
    %c0_11 = arith.constant 0 : index
    %c0_12 = arith.constant 0 : index
    %18 = vector.load %arg4[%c0_10, %c0_11, %c0_12] : memref<1x16x1xf32, #tpu.memory_space<vmem>>, vector<1x16x1xf32>
    %19 = vector.shape_cast %18 : vector<1x16x1xf32> to vector<16x1xf32>
    %20 = vector.shape_cast %17 : vector<16x1xf32> to vector<1x16x1xf32>
    tpu.vector_store %arg4[%c0_10, %c0_11, %c0_12], %20 {strides = array<i32>} : memref<1x16x1xf32, #tpu.memory_space<vmem>>, vector<1x16x1xf32>,
    %c0_13 = arith.constant 0 : index
    %c0_14 = arith.constant 0 : index
    %c0_15 = arith.constant 0 : index
    %21 = vector.load %arg5[%c0_13, %c0_14, %c0_15] : memref<1x16x1xf32, #tpu.memory_space<vmem>>, vector<1x16x1xf32>
    %22 = vector.shape_cast %21 : vector<1x16x1xf32> to vector<16x1xf32>
    %23 = arith.mulf %11, %11 : vector<16x128xf32>
    %cst_16 = arith.constant dense<0.000000e+00> : vector<16xf32>
    %24 = vector.multi_reduction <add>, %23, %cst_16 [1] : vector<16x128xf32> to vector<16xf32>
    %25 = vector.shape_cast %24 : vector<16xf32> to vector<16x1xf32>
    %26 = arith.addf %22, %25 : vector<16x1xf32>
    %c0_17 = arith.constant 0 : index
    %c0_18 = arith.constant 0 : index
    %c0_19 = arith.constant 0 : index
    %27 = vector.load %arg5[%c0_17, %c0_18, %c0_19] : memref<1x16x1xf32, #tpu.memory_space<vmem>>, vector<1x16x1xf32>
    %28 = vector.shape_cast %27 : vector<1x16x1xf32> to vector<16x1xf32>
    %29 = vector.shape_cast %26 : vector<16x1xf32> to vector<1x16x1xf32>
    tpu.vector_store %arg5[%c0_17, %c0_18, %c0_19], %29 {strides = array<i32>} : memref<1x16x1xf32, #tpu.memory_space<vmem>>, vector<1x16x1xf32>,
    %c0_20 = arith.constant 0 : index
    %c0_21 = arith.constant 0 : index
    %c0_22 = arith.constant 0 : index
    %30 = vector.load %arg6[%c0_20, %c0_21, %c0_22] : memref<1x16x1xf32, #tpu.memory_space<vmem>>, vector<1x16x1xf32>
    %31 = vector.shape_cast %30 : vector<1x16x1xf32> to vector<16x1xf32>
    %32 = arith.mulf %4, %4 : vector<16x128xf32>
    %cst_23 = arith.constant dense<0.000000e+00> : vector<16xf32>
    %33 = vector.multi_reduction <add>, %32, %cst_23 [1] : vector<16x128xf32> to vector<16xf32>
    %34 = vector.shape_cast %33 : vector<16xf32> to vector<16x1xf32>
    %35 = arith.addf %31, %34 : vector<16x1xf32>
    %c0_24 = arith.constant 0 : index
    %c0_25 = arith.constant 0 : index
    %c0_26 = arith.constant 0 : index
    %36 = vector.load %arg6[%c0_24, %c0_25, %c0_26] : memref<1x16x1xf32, #tpu.memory_space<vmem>>, vector<1x16x1xf32>
    %37 = vector.shape_cast %36 : vector<1x16x1xf32> to vector<16x1xf32>
    %38 = vector.shape_cast %35 : vector<16x1xf32> to vector<1x16x1xf32>
    tpu.vector_store %arg6[%c0_24, %c0_25, %c0_26], %38 {strides = array<i32>} : memref<1x16x1xf32, #tpu.memory_space<vmem>>, vector<1x16x1xf32>,
    return
  }
  func.func @transform_0(%arg0: i32, %arg1: i32) -> (i32, i32) {
    %c1_i32 = arith.constant 1 : i32
    %0 = arith.muli %arg0, %c1_i32 : i32
    %1 = arith.addi %0, %arg1 : i32
    %c0_i32 = arith.constant 0 : i32
    %c0_i32_0 = arith.constant 0 : i32
    return %c0_i32, %1 : i32, i32
  }
  func.func @transform_1(%arg0: i32, %arg1: i32) -> (i32, i32) {
    %c1_i32 = arith.constant 1 : i32
    %0 = arith.muli %arg0, %c1_i32 : i32
    %1 = arith.addi %0, %arg1 : i32
    %c0_i32 = arith.constant 0 : i32
    %c0_i32_0 = arith.constant 0 : i32
    return %c0_i32, %1 : i32, i32
  }
  func.func @transform_2(%arg0: i32, %arg1: i32) -> (i32, i32, i32) {
    %c0_i32 = arith.constant 0 : i32
    %c0_i32_0 = arith.constant 0 : i32
    %c0_i32_1 = arith.constant 0 : i32
    return %arg0, %c0_i32, %c0_i32_0 : i32, i32, i32
  }
  func.func @transform_3(%arg0: i32, %arg1: i32) -> (i32, i32, i32) {
    %c0_i32 = arith.constant 0 : i32
    %c0_i32_0 = arith.constant 0 : i32
    %c0_i32_1 = arith.constant 0 : i32
    return %arg0, %c0_i32, %c0_i32_0 : i32, i32, i32
  }
  func.func @transform_4(%arg0: i32, %arg1: i32) -> (i32, i32, i32) {
    %c0_i32 = arith.constant 0 : i32
    %c0_i32_0 = arith.constant 0 : i32
    %c0_i32_1 = arith.constant 0 : i32
    return %arg0, %c0_i32, %c0_i32_0 : i32, i32, i32
  }
}

</mosaic_0001>

<bundles_post_ra>
// kernel: dice_loss.1
= control target key start
LH: loop header
LB: loop body
LE: loop exit
PB: predicated region body
PF: predicated region fallthrough
CT: control target
= control target key end

     0   :  { %vm52_vm0 = vcmask 7168   ;;  %v137_v2 = vmov 0.0   ;;  %s241_s0 = inlined_call_operand.vmem [shape: f32[16,128], index: 0, kind: input, shape index: {}]   ;;  %s242_s3 = inlined_call_operand.vmem [shape: f32[1,16,1], index: 3, kind: output, shape index: {1}]   ;;  %s243_s1 = inlined_call_operand.vmem [shape: f32[16,128], index: 1, kind: input, shape index: {}]   ;;  %s244_s2 = inlined_call_operand.vmem [shape: f32[1,16,1], index: 2, kind: output, shape index: {0}]   ;;  %s245_s4 = inlined_call_operand.vmem [shape: f32[1,16,1], index: 4, kind: output, shape index: {2}]  }
   0x1   :  { %v59_v0 = vld [vmem:[%s241_s0] sm:$0xff]  ;;  %v60_v1 = vld [vmem:[%s241_s0 + $0x8] sm:$0xff]  ;;  %55 = vst.msk [vmem:[%s242_s3] sm:$0xff] %vm52_vm0, %v137_v2  ;;  %56 = vst.msk [vmem:[%s242_s3 + $0x8] sm:$0xff] %vm52_vm0, %v137_v2 }
   0x2   :  { %v63_v3 = vmul.f32 0.5, %v59_v0  ;;  %v64_v4 = vmul.f32 0.5, %v60_v1  ;;  %v61_v8 = vld [vmem:[%s243_s1] sm:$0xff]  ;;  %v62_v12 = vld [vmem:[%s243_s1 + $0x8] sm:$0xff]  ;;  %53 = vst.msk [vmem:[%s244_s2] sm:$0xff] %vm52_vm0, %v137_v2  ;;  %54 = vst.msk [vmem:[%s244_s2 + $0x8] sm:$0xff] %vm52_vm0, %v137_v2 }
   0x3   :  { %v99_v17 = vmul.f32 %v62_v12, %v62_v12  ;;  %v98_v18 = vmul.f32 %v61_v8, %v61_v8  ;;  %58 = vst.msk [vmem:[%s245_s4 + $0x8] sm:$0xff] %vm52_vm0, %v137_v2  ;;  %57 = vst.msk [vmem:[%s245_s4] sm:$0xff] %vm52_vm0, %v137_v2 }
   0x4   :  { %133 = vtanh.f32 %v63_v3 }
   0x5   :  { %135 = vtanh.f32 %v64_v4 }
   0x8   :  { %v84_v19 = vld [vmem:[%s242_s3] sm:$0xff]  ;;  %v85_v25 = vld [vmem:[%s242_s3 + $0x8] sm:$0xff] }
   0x9   :  { %v71_v20 = vld [vmem:[%s244_s2] sm:$0xff]  ;;  %v72_v26 = vld [vmem:[%s244_s2 + $0x8] sm:$0xff] }
   0xa   :  { %v97_v31 = vld [vmem:[%s245_s4 + $0x8] sm:$0xff]  ;;  %v96_v32 = vld [vmem:[%s245_s4] sm:$0xff] }
   0xe   :  { %v134_v5 = vpop.eup %133 }
   0xf   :  { %v136_v6 = vpop.eup %135  ;;  %v67_v7 = vadd.f32 1.0, %v134_v5 }
  0x10   :  { %v68_v9 = vadd.f32 1.0, %v136_v6 }
  0x11   :  { %v69_v10 = vmul.f32 0.5, %v67_v7 }
  0x12   :  { %v70_v11 = vmul.f32 0.5, %v68_v9 }
  0x13   :  { %v86_v13 = vmul.f32 %v69_v10, %v69_v10  ;;  %v73_v14 = vmul.f32 %v69_v10, %v61_v8 }
  0x14   :  { %v87_v15 = vmul.f32 %v70_v11, %v70_v11  ;;  %v74_v16 = vmul.f32 %v70_v11, %v62_v12 }
  0x15   :  { %88 = vadd.xlane.f32.xlu1 %v86_v13  ;;  %75 = vadd.xlane.f32.xlu0 %v73_v14 }
  0x19   :  { %90 = vadd.xlane.f32.xlu1 %v87_v15  ;;  %77 = vadd.xlane.f32.xlu0 %v74_v16 }
  0x1d   :  { %102 = vadd.xlane.f32.xlu1 %v99_v17  ;;  %100 = vadd.xlane.f32.xlu0 %v98_v18 }
  0xa2   :  { %v89_v21 = vpop.xlane.xlu1 %88  ;;  %v76_v22 = vpop.xlane.xlu0 %75 }
  0xa3   :  { %v92_v23 = vadd.f32 %v89_v21, %v84_v19  ;;  %v79_v24 = vadd.f32 %v76_v22, %v71_v20 }
  0xa5   :  { %94 = vst.msk [vmem:[%s242_s3] sm:$0xff] %vm52_vm0, %v92_v23  ;;  %82 = vst.msk [vmem:[%s244_s2] sm:$0xff] %vm52_vm0, %v79_v24 }
  0xa6   :  { %v91_v27 = vpop.xlane.xlu1 %90  ;;  %v78_v28 = vpop.xlane.xlu0 %77 }
  0xa7   :  { %v93_v29 = vadd.f32 %v91_v27, %v85_v25  ;;  %v80_v30 = vadd.f32 %v78_v28, %v72_v26 }
  0xa9   :  { %95 = vst.msk [vmem:[%s242_s3 + $0x8] sm:$0xff] %vm52_vm0, %v93_v29  ;;  %83 = vst.msk [vmem:[%s244_s2 + $0x8] sm:$0xff] %vm52_vm0, %v80_v30 }
  0xaa   :  { %v103_v33 = vpop.xlane.xlu1 %102  ;;  %v101_v34 = vpop.xlane.xlu0 %100 }
  0xab   :  { %v105_v35 = vadd.f32 %v103_v33, %v97_v31  ;;  %v104_v36 = vadd.f32 %v101_v34, %v96_v32 }
  0xad   :  { %107 = vst.msk [vmem:[%s245_s4 + $0x8] sm:$0xff] %vm52_vm0, %v105_v35  ;;  %106 = vst.msk [vmem:[%s245_s4] sm:$0xff] %vm52_vm0, %v104_v36 }

</bundles_post_ra>
